<compile_context>
chip_gen: v6e
topology: v6e:2x2x1
jax: 0.10.0
libtpu: 0.0.40
codegen_flags: <defaults>
</compile_context>

<pallas_src>
import functools
import math

import jax
import jax.numpy as jnp
from jax.experimental import pallas as pl
from jax.experimental.pallas import tpu as pltpu


def make_positional_encoding_buffer(d_model, max_len=5000, dtype=jnp.float32):
    """Deterministically builds the same `pe` buffer as the PyTorch __init__."""
    position = jnp.arange(0, max_len, dtype=jnp.float32)[:, None]            # (max_len, 1)
    div_term = jnp.exp(
        jnp.arange(0, d_model, 2, dtype=jnp.float32) * (-math.log(10000.0) / d_model)
    )                                                                         # (d_model/2,)
    pe = jnp.zeros((max_len, d_model), dtype=jnp.float32)
    pe = pe.at[:, 0::2].set(jnp.sin(position * div_term))
    pe = pe.at[:, 1::2].set(jnp.cos(position * div_term))
    # .unsqueeze(0).transpose(0, 1) -> (max_len, 1, d_model), like the registered buffer
    return pe[:, None, :].astype(dtype)


def _pe_add_kernel(x_ref, pe_ref, out_ref):
    # x_ref: (TS, B, D), pe_ref: (TS, 1, D) — broadcast add over the batch (sublane) axis.
    out_ref[...] = (x_ref[...] + pe_ref[...]).astype(out_ref.dtype)


def _pe_add_dropout_kernel(x_ref, pe_ref, u_ref, out_ref, *, dropout_p, scale):
    # TODO(synk): on real TPU, switch dropout RNG to in-kernel
    # pltpu.prng_seed/prng_random_bits to avoid streaming the random field from
    # HBM (those primitives are not lowerable in interpret mode).
    y = x_ref[...] + pe_ref[...]                                  # (TS, B, D)
    keep = u_ref[...] >= jnp.float32(dropout_p)                   # keep w.p. 1-p
    out_ref[...] = jnp.where(
        keep, y * jnp.float32(scale), jnp.zeros_like(y)
    ).astype(out_ref.dtype)


def positional_encoding_forward(x, pe, *, dropout_p=0.1, training=False, rng_key=None):
    """Forward pass of PositionalEncoding.

    x:  (seq_len, batch, d_model)   (PyTorch nn.Transformer convention)
    pe: (max_len, 1, d_model)       (registered buffer)
    """
    S, B, D = x.shape
    pe_s = pe[:S].astype(x.dtype)                                 # (S, 1, D) == pe[:x.size(0), :]

    # Tile seq_len so one x tile is ~1 MiB: big enough to amortize per-step
    # overhead, small enough that double-buffered in/out/pe/rand fits every
    # chip's default scoped VMEM (no explicit vmem_limit_bytes needed).
    itemsize = jnp.dtype(x.dtype).itemsize
    row_bytes = max(1, B * D * itemsize)
    ts = max(1, min(S, (1 << 20) // row_bytes))
    if ts >= 8:
        ts -= ts % 8
    grid = (pl.cdiv(S, ts),)

    x_spec = pl.BlockSpec((ts, B, D), lambda s: (s, 0, 0))
    pe_spec = pl.BlockSpec((ts, 1, D), lambda s: (s, 0, 0))
    out_shape = jax.ShapeDtypeStruct((S, B, D), x.dtype)
    compiler_params = pltpu.CompilerParams(dimension_semantics=("parallel",))

    if training and dropout_p > 0.0:
        if rng_key is None:
            rng_key = jax.random.PRNGKey(0)
        u = jax.random.uniform(rng_key, (S, B, D), dtype=jnp.float32)
        kernel = functools.partial(
            _pe_add_dropout_kernel,
            dropout_p=float(dropout_p),
            scale=1.0 / (1.0 - float(dropout_p)),
        )
        return pl.pallas_call(
            kernel,
            out_shape=out_shape,
            grid=grid,
            in_specs=[x_spec, pe_spec, pl.BlockSpec((ts, B, D), lambda s: (s, 0, 0))],
            out_specs=x_spec,
            compiler_params=compiler_params,
        )(x, pe_s, u)

    return pl.pallas_call(
        _pe_add_kernel,
        out_shape=out_shape,
        grid=grid,
        in_specs=[x_spec, pe_spec],
        out_specs=x_spec,
        compiler_params=compiler_params,
    )(x, pe_s)


if __name__ == "__main__":
    # Small shapes: seq_len=8, batch=2, d_model=32 (seq-first, matching the module).
    S, B, D = 8, 2, 32
    dropout_p = 0.1

    key = jax.random.PRNGKey(0)
    x = jax.random.normal(key, (S, B, D), dtype=jnp.float32)
    pe = make_positional_encoding_buffer(D, max_len=5000)

    # Eval mode (dropout is identity): must match x + pe[:S] exactly.
    out_eval = positional_encoding_forward(x, pe, dropout_p=dropout_p, training=False)
    out_eval = jax.block_until_ready(out_eval)
    ref = x + pe[:S, :]                                           # broadcast over batch
    assert out_eval.shape == (S, B, D)
    assert jnp.allclose(out_eval, ref, atol=1e-6, rtol=1e-6), "eval-mode mismatch"

    # Training mode: elements are either 0 (dropped) or ref / (1 - p) (kept & rescaled).
    out_train = positional_encoding_forward(
        x, pe, dropout_p=dropout_p, training=True, rng_key=jax.random.PRNGKey(123)
    )
    out_train = jax.block_until_ready(out_train)
    scaled_ref = ref / (1.0 - dropout_p)
    ok = jnp.all(
        (out_train == 0.0) | jnp.isclose(out_train, scaled_ref, atol=1e-5, rtol=1e-5)
    )
    assert bool(ok), "training-mode dropout semantics mismatch"

    print("KERNEL_OK")
</pallas_src>

<mosaic_0001>
module attributes {stable_mosaic.version = 11 : i64} {
  func.func @_pe_add_kernel(%arg0: i32, %arg1: memref<8x2x32xf32, #tpu.memory_space<vmem>>, %arg2: memref<8x1x32xf32, #tpu.memory_space<vmem>>, %arg3: memref<8x2x32xf32, #tpu.memory_space<vmem>>) attributes {dimension_semantics = [#tpu.dimension_semantics<parallel>], iteration_bounds = array<i64: 1>, scalar_prefetch = 0 : i64, scratch_operands = 0 : i64, tpu.core_type = #tpu.core_type<tc>, window_params = [{transform_indices = @transform_0, window_bounds = array<i64: 8, 2, 32>}, {transform_indices = @transform_1, window_bounds = array<i64: 8, 1, 32>}, {transform_indices = @transform_2, window_bounds = array<i64: 8, 2, 32>}]} {
    %c0 = arith.constant 0 : index
    %c0_0 = arith.constant 0 : index
    %c0_1 = arith.constant 0 : index
    %0 = vector.load %arg1[%c0, %c0_0, %c0_1] : memref<8x2x32xf32, #tpu.memory_space<vmem>>, vector<8x2x32xf32>
    %c0_2 = arith.constant 0 : index
    %c0_3 = arith.constant 0 : index
    %c0_4 = arith.constant 0 : index
    %1 = vector.load %arg2[%c0_2, %c0_3, %c0_4] : memref<8x1x32xf32, #tpu.memory_space<vmem>>, vector<8x1x32xf32>
    %2 = vector.broadcast %1 : vector<8x1x32xf32> to vector<8x2x32xf32>
    %3 = arith.addf %0, %2 : vector<8x2x32xf32>
    %c0_5 = arith.constant 0 : index
    %c0_6 = arith.constant 0 : index
    %c0_7 = arith.constant 0 : index
    %4 = vector.load %arg3[%c0_5, %c0_6, %c0_7] : memref<8x2x32xf32, #tpu.memory_space<vmem>>, vector<8x2x32xf32>
    tpu.vector_store %arg3[%c0_5, %c0_6, %c0_7], %3 {strides = array<i32>} : memref<8x2x32xf32, #tpu.memory_space<vmem>>, vector<8x2x32xf32>,
    return
  }
  func.func @transform_0(%arg0: i32) -> (i32, i32, i32) {
    %c0_i32 = arith.constant 0 : i32
    %c0_i32_0 = arith.constant 0 : i32
    %c0_i32_1 = arith.constant 0 : i32
    return %arg0, %c0_i32, %c0_i32_0 : i32, i32, i32
  }
  func.func @transform_1(%arg0: i32) -> (i32, i32, i32) {
    %c0_i32 = arith.constant 0 : i32
    %c0_i32_0 = arith.constant 0 : i32
    %c0_i32_1 = arith.constant 0 : i32
    return %arg0, %c0_i32, %c0_i32_0 : i32, i32, i32
  }
  func.func @transform_2(%arg0: i32) -> (i32, i32, i32) {
    %c0_i32 = arith.constant 0 : i32
    %c0_i32_0 = arith.constant 0 : i32
    %c0_i32_1 = arith.constant 0 : i32
    return %arg0, %c0_i32, %c0_i32_0 : i32, i32, i32
  }
}

</mosaic_0001>

<bundles_post_ra>
// kernel: tpu_custom_call.1
= control target key start
LH: loop header
LB: loop body
LE: loop exit
PB: predicated region body
PF: predicated region fallthrough
CT: control target
= control target key end

     0   :  { %7 = vsyncpa [#allocation3], 0  ;;  %s268_s0 = inlined_call_operand.hbm [shape: f32[8,2,32], index: 0, kind: input, shape index: {}]   ;;  %s269_s1 = inlined_call_operand.hbm [shape: f32[8,1,32], index: 1, kind: input, shape index: {}]   ;;  %s270_s2 = inlined_call_operand.hbm [shape: f32[8,2,32], index: 2, kind: output, shape index: {}]  }
   0x1   :  { %8 = vsyncpa [#allocation6], 0 }
   0x2   :  { %9 = vsyncpa [#allocation4], 0  ;;  %s220_s9 = smov [#allocation2]  }
   0x3   :  { %s15_s10 = sshll.u32 %s220_s9, 4  ;;  %s16_s10 = int_to_ptr.vmem [resolvable:$true] %s15_s10 }
   0x4   :  { %s162_s11 = scalar_lea.vmem %s16_s10, 256  ;;  %p167_p1 = scmp.lt.s32.totalorder %s16_s10, %s16_s10 }
   0x5   :  { %p163_p0 = scmp.ne.s32.totalorder %s16_s10, %s162_s11  ;;  %p168_p2 = scmp.lt.s32.totalorder %s162_s11, %s162_s11 }
   0x7   :  { %p169_p3 = por %p168_p2, %p167_p1 }
   0x9   :  { %p170_p4 = pnand %p169_p3, %p163_p0 }
   0xb   :  { %173 = shalt.err (!%p170_p4)
}
   0xc   :  { %s221_s12 = smov 32   ;;  %s222_s13 = smov 2  }
   0xd   :  { %21 = dma.hbm_to_vmem [thread:$0]  %s268_s0, 256, %s16_s10, [#allocation3], %s221_s12, %s221_s12, %s222_s13  }
   0xe   :  { %s223_s16 = smov [#allocation5]  }
   0xf   :  { %s27_s17 = sshll.u32 %s223_s16, 4  ;;  %s28_s17 = int_to_ptr.vmem [resolvable:$true] %s27_s17 }
  0x10   :  { %s182_s18 = scalar_lea.vmem %s28_s17, 128  ;;  %p187_p6 = scmp.lt.s32.totalorder %s28_s17, %s28_s17 }
  0x11   :  { %p183_p5 = scmp.ne.s32.totalorder %s28_s17, %s182_s18  ;;  %p188_p7 = scmp.lt.s32.totalorder %s182_s18, %s182_s18 }
  0x13   :  { %p189_p8 = por %p188_p7, %p187_p6 }
  0x15   :  { %p190_p9 = pnand %p189_p8, %p183_p5 }
  0x17   :  { %193 = shalt.err (!%p190_p9)
}
  0x18   :  { %s224_s19 = smov 16   ;;  %s225_s20 = smov 1  }
  0x19   :  { %33 = dma.hbm_to_vmem [thread:$0]  %s269_s1, 128, %s28_s17, [#allocation6], %s224_s19, %s224_s19, %s225_s20  }
  0x1a   :  { %214 = dma.done.wait [#allocation3], 256  }
  0x1b   :  { %215 = vsyncadd [#allocation3], 4294967040 }
  0x1c   :  { %216 = dma.done.wait [#allocation6], 128  }
  0x1d   :  { %217 = vsyncadd [#allocation6], 4294967168  ;;  %vm112_vm0 = vcmask 254976   ;;  %s226_s0 = smov [#allocation7]   ;;  %v40_v0 = vld [vmem:[#allocation2] sm:$0x3] }
  0x1e   :  { %s251_s23 = sshll.u32 %s226_s0, 4  ;;  %v139_v1 = vld [vmem:[#allocation5] ss:$0 sm:$0xff]  ;;  %v41_v2 = vld [vmem:[#allocation2 + $0x2] sm:$0x3]  ;;  %s127_s23 = int_to_ptr.vmem [resolvable:$true] %s251_s23 }
  0x1f   :  { %v104_v3 = vadd.f32 %v139_v1, %v40_v0  ;;  %v140_v4 = vld [vmem:[#allocation5 + $0x1] ss:$0 sm:$0xff]  ;;  %v42_v5 = vld [vmem:[#allocation2 + $0x4] sm:$0x3]  ;;  %v141_v6 = vld [vmem:[#allocation5 + $0x2] ss:$0 sm:$0xff]  ;;  %p199_p11 = scmp.lt.s32.totalorder %s127_s23, %s127_s23 }
  0x20   :  { %v105_v7 = vadd.f32 %v140_v4, %v41_v2  ;;  %v106_v8 = vadd.f32 %v141_v6, %v42_v5  ;;  %v43_v9 = vld [vmem:[#allocation2 + $0x6] sm:$0x3]  ;;  %v142_v10 = vld [vmem:[#allocation5 + $0x3] ss:$0 sm:$0xff]  ;;  %v44_v11 = vld [vmem:[#allocation2 + $0x8] sm:$0x3] }
  0x21   :  { %113 = vst.msk [vmem:[#allocation7] sm:$0x3] %vm112_vm0, %v104_v3  ;;  %v107_v12 = vadd.f32 %v142_v10, %v43_v9  ;;  %v143_v13 = vld [vmem:[#allocation5 + $0x4] ss:$0 sm:$0xff]  ;;  %v45_v14 = vld [vmem:[#allocation2 + $0xa] sm:$0x3] }
  0x22   :  { %v144_v15 = vld [vmem:[#allocation5 + $0x5] ss:$0 sm:$0xff]  ;;  %114 = vst.msk [vmem:[#allocation7 + $0x2] sm:$0x3] %vm112_vm0, %v105_v7  ;;  %115 = vst.msk [vmem:[#allocation7 + $0x4] sm:$0x3] %vm112_vm0, %v106_v8  ;;  %v108_v16 = vadd.f32 %v143_v13, %v44_v11 }
  0x23   :  { %v109_v17 = vadd.f32 %v144_v15, %v45_v14  ;;  %v46_v18 = vld [vmem:[#allocation2 + $0xc] sm:$0x3]  ;;  %v145_v19 = vld [vmem:[#allocation5 + $0x6] ss:$0 sm:$0xff]  ;;  %v47_v20 = vld [vmem:[#allocation2 + $0xe] sm:$0x3] }
  0x24   :  { %116 = vst.msk [vmem:[#allocation7 + $0x6] sm:$0x3] %vm112_vm0, %v107_v12  ;;  %v110_v21 = vadd.f32 %v145_v19, %v46_v18  ;;  %v146_v22 = vld [vmem:[#allocation5 + $0x7] ss:$0 sm:$0xff]  ;;  %117 = vst.msk [vmem:[#allocation7 + $0x8] sm:$0x3] %vm112_vm0, %v108_v16 }
  0x25   :  { %118 = vst.msk [vmem:[#allocation7 + $0xa] sm:$0x3] %vm112_vm0, %v109_v17  ;;  %v111_v23 = vadd.f32 %v146_v22, %v47_v20  ;;  %s194_s1 = scalar_lea.vmem %s127_s23, 256 }
  0x26   :  { %119 = vst.msk [vmem:[#allocation7 + $0xc] sm:$0x3] %vm112_vm0, %v110_v21  ;;  %p195_p10 = scmp.ne.s32.totalorder %s127_s23, %s194_s1  ;;  %p200_p12 = scmp.lt.s32.totalorder %s194_s1, %s194_s1 }
  0x27   :  { %120 = vst.msk [vmem:[#allocation7 + $0xe] sm:$0x3] %vm112_vm0, %v111_v23 }
  0x28   :  { %p201_p13 = por %p200_p12, %p199_p11 }
  0x2a   :  { %p202_p0 = pnand %p201_p13, %p195_p10 }
  0x2c   :  { %205 = shalt.err (!%p202_p0)
}
  0x2d   :  { %132 = dma.vmem_to_hbm [thread:$0]  %s127_s23, 256, %s270_s2, [#allocation4], %s221_s12, %s221_s12, %s222_s13  }
  0x2e   :  { %218 = dma.done.wait [#allocation4], 256  }
  0x2f   :  { %219 = vsyncadd [#allocation4], 4294967040 }
  0x30   :  { %136 = vsyncpa [#allocation3], 1 }
  0x31   :  { %137 = vsyncpa [#allocation6], 1 }
  0x32   :  { %138 = vsyncpa [#allocation4], 1 }

</bundles_post_ra>
